<compile_context>
chip_gen: v5e
topology: v5e:2x2
jax: 0.10.0
libtpu: 0.0.40
codegen_flags: <defaults>
</compile_context>

<pallas_src>
import functools

import jax
import jax.numpy as jnp
from jax.experimental import pallas as pl
from jax.experimental.pallas import tpu as pltpu


def _round_up(x: int, m: int) -> int:
    return ((x + m - 1) // m) * m


def _focal_loss_kernel(logits_ref, targets_ref, alpha_ref, out_ref, *,
                       gamma: float, ignore_index: int):
    x = logits_ref[...]          # (C, T) f32  -- samples on the lane axis
    t = targets_ref[...]         # (1, T) i32
    a = alpha_ref[...]           # (C, 1) f32
    c, tn = x.shape

    # --- log-sum-exp over classes (sublane axis) ---
    m = jnp.max(x, axis=0, keepdims=True)                                # (1, T)
    lse = jnp.log(jnp.sum(jnp.exp(x - m), axis=0, keepdims=True)) + m    # (1, T)

    cls = jax.lax.broadcasted_iota(jnp.int32, (c, tn), 0)                # (C, T)
    onehot = cls == t                                                    # (C, T)
    valid = t != ignore_index                                            # (1, T)

    # Gather only the target logit / target alpha; do NOT materialize the
    # full (C, T) log-probability tensor.
    x_t = jnp.sum(jnp.where(onehot, x, 0.0), axis=0, keepdims=True)      # (1, T)
    w_t = jnp.sum(jnp.where(onehot, a, jnp.float32(0.0)),
                  axis=0, keepdims=True)                                 # (1, T)
    logp_t = x_t - lse                                                   # (1, T)

    # weighted CE (reduction='none'); ignored / padded samples -> exactly 0
    ce = jnp.where(valid, -w_t * logp_t, 0.0)                            # (1, T)

    # --- focal modulation ---
    pt = jnp.exp(-ce)
    u = jnp.maximum(1.0 - pt, 0.0)        # clamp: avoids NaN from pow(neg eps)
    if float(gamma) == 2.0:
        mod = u * u                       # VPU multiply, no EUP pow
    elif float(gamma).is_integer() and 0 <= int(gamma) <= 16:
        mod = jnp.ones_like(u)
        for _ in range(int(gamma)):
            mod = mod * u
    else:
        mod = u ** jnp.float32(gamma)
    focal = mod * ce                                                     # (1, T)

    # Per-tile partial sum, broadcast across a full 128-lane output block so
    # the store is lane-dense/unmasked; wrapper reduces + divides by N.
    tile_sum = jnp.sum(focal, axis=1, keepdims=True)                     # (1, 1)
    out_ref[...] = jnp.broadcast_to(tile_sum, (1, 128))


def focal_loss(logits, targets, alpha, gamma: float = 2.0,
               ignore_index: int = -100):
    """logits: (N, C) float, targets: (N,) int, alpha: (C,) float."""
    n, c = logits.shape

    # Lane-dense layout for small C: classes on sublanes, samples on lanes.
    logits_t = jnp.transpose(logits.astype(jnp.float32))          # (C, N)
    targets_row = targets.astype(jnp.int32).reshape(1, n)         # (1, N)
    alpha_col = alpha.astype(jnp.float32).reshape(c, 1)           # (C, 1)

    # Tile size along N: keep a double-buffered logits tile well inside the
    # smallest scoped-VMEM default (v5e: 16 MiB) => ~4 MiB per tile budget.
    # TODO(synk): very large C (>~8k classes) would need a C-tiled two-pass LSE.
    budget_bytes = 4 * 1024 * 1024
    tile_cap = max(128, min(2048, (budget_bytes // (c * 4)) // 128 * 128))
    tile_n = min(tile_cap, _round_up(n, 128))
    n_pad = _round_up(n, tile_n)
    num_tiles = n_pad // tile_n

    if n_pad != n:
        pad = n_pad - n
        logits_t = jnp.pad(logits_t, ((0, 0), (0, pad)))
        # padded samples are marked ignored -> contribute exactly 0
        targets_row = jnp.pad(targets_row, ((0, 0), (0, pad)),
                              constant_values=ignore_index)

    kernel = functools.partial(_focal_loss_kernel, gamma=gamma,
                               ignore_index=ignore_index)

    partial_sums = pl.pallas_call(
        kernel,
        out_shape=jax.ShapeDtypeStruct((1, num_tiles * 128), jnp.float32),
        grid_spec=pltpu.PrefetchScalarGridSpec(
            num_scalar_prefetch=0,
            grid=(num_tiles,),
            in_specs=[
                pl.BlockSpec((c, tile_n), lambda i: (0, i)),   # logits tile
                pl.BlockSpec((1, tile_n), lambda i: (0, i)),   # targets tile
                pl.BlockSpec((c, 1), lambda i: (0, 0)),        # alpha (resident)
            ],
            out_specs=pl.BlockSpec((1, 128), lambda i: (0, i)),
        ),
        compiler_params=pltpu.CompilerParams(
            dimension_semantics=("parallel",),
        ),
    )(logits_t, targets_row, alpha_col)

    # One partial sum per tile (replicated over 128 lanes); mean over original N.
    per_tile = partial_sums.reshape(num_tiles, 128)[:, 0]
    return jnp.sum(per_tile) / jnp.float32(n)


def _focal_loss_ref(logits, targets, alpha, gamma=2.0, ignore_index=-100):
    # Pure-JAX reference mirroring nn.CrossEntropyLoss(weight, ignore_index,
    # reduction='none') followed by focal modulation and .mean().
    logp = jax.nn.log_softmax(logits.astype(jnp.float32), axis=-1)
    safe_t = jnp.where(targets == ignore_index, 0, targets)
    logp_t = jnp.take_along_axis(logp, safe_t[:, None], axis=-1)[:, 0]
    w_t = alpha[safe_t]
    valid = targets != ignore_index
    ce = jnp.where(valid, -w_t * logp_t, 0.0)
    pt = jnp.exp(-ce)
    focal = (1.0 - pt) ** gamma * ce
    return jnp.mean(focal)


if __name__ == "__main__":
    key = jax.random.PRNGKey(0)
    k_logits, k_targets, k_alpha = jax.random.split(key, 3)

    N, C = 16, 8  # e.g. batch=2 * seq=8 flattened, 8 classes
    logits = jax.random.normal(k_logits, (N, C), dtype=jnp.float32)
    targets = jax.random.randint(k_targets, (N,), 0, C, dtype=jnp.int32)
    # deterministically mark a couple of positions as ignored
    targets = targets.at[3].set(-100).at[11].set(-100)
    # deterministic per-class alpha weights (as would be passed to __init__)
    alpha = 0.5 + 0.05 * jnp.arange(C, dtype=jnp.float32)

    out = focal_loss(logits, targets, alpha, gamma=2.0, ignore_index=-100)
    out = jax.block_until_ready(out)

    ref = _focal_loss_ref(logits, targets, alpha, gamma=2.0, ignore_index=-100)
    assert jnp.allclose(out, ref, rtol=1e-5, atol=1e-6), (out, ref)

    print("KERNEL_OK")
</pallas_src>

<mosaic_0001>
module attributes {stable_mosaic.version = 11 : i64} {
  func.func @_focal_loss_kernel(%arg0: i32, %arg1: memref<8x128xf32, #tpu.memory_space<vmem>>, %arg2: memref<1x128xi32, #tpu.memory_space<vmem>>, %arg3: memref<8x1xf32, #tpu.memory_space<vmem>>, %arg4: memref<1x128xf32, #tpu.memory_space<vmem>>) attributes {dimension_semantics = [#tpu.dimension_semantics<parallel>], iteration_bounds = array<i64: 1>, scalar_prefetch = 0 : i64, scratch_operands = 0 : i64, tpu.core_type = #tpu.core_type<tc>, window_params = [{transform_indices = @transform_0, window_bounds = array<i64: 8, 128>}, {transform_indices = @transform_1, window_bounds = array<i64: 1, 128>}, {pipeline_mode = #tpu.pipeline_mode<synchronous>, transform_indices = @transform_2, window_bounds = array<i64: 8, 1>}, {transform_indices = @transform_3, window_bounds = array<i64: 1, 128>}]} {
    %c0 = arith.constant 0 : index
    %c0_0 = arith.constant 0 : index
    %0 = vector.load %arg1[%c0, %c0_0] : memref<8x128xf32, #tpu.memory_space<vmem>>, vector<8x128xf32>
    %c0_1 = arith.constant 0 : index
    %c0_2 = arith.constant 0 : index
    %1 = vector.load %arg2[%c0_1, %c0_2] : memref<1x128xi32, #tpu.memory_space<vmem>>, vector<1x128xi32>
    %c0_3 = arith.constant 0 : index
    %c0_4 = arith.constant 0 : index
    %2 = vector.load %arg3[%c0_3, %c0_4] : memref<8x1xf32, #tpu.memory_space<vmem>>, vector<8x1xf32>
    %cst = arith.constant dense<0xFF800000> : vector<128xf32>
    %3 = vector.multi_reduction <maximumf>, %0, %cst [0] : vector<8x128xf32> to vector<128xf32>
    %4 = vector.shape_cast %3 : vector<128xf32> to vector<1x128xf32>
    %5 = vector.broadcast %4 : vector<1x128xf32> to vector<8x128xf32>
    %6 = arith.subf %0, %5 : vector<8x128xf32>
    %7 = math.exp %6 : vector<8x128xf32>
    %cst_5 = arith.constant dense<0.000000e+00> : vector<128xf32>
    %8 = vector.multi_reduction <add>, %7, %cst_5 [0] : vector<8x128xf32> to vector<128xf32>
    %9 = vector.shape_cast %8 : vector<128xf32> to vector<1x128xf32>
    %10 = math.log %9 : vector<1x128xf32>
    %11 = arith.addf %10, %4 : vector<1x128xf32>
    %12 = tpu.iota {dimensions = array<i32: 0>} : vector<8x128xi32>
    %13 = vector.broadcast %1 : vector<1x128xi32> to vector<8x128xi32>
    %14 = arith.cmpi eq, %12, %13 : vector<8x128xi32>
    %c-100_i32 = arith.constant -100 : i32
    %15 = vector.broadcast %c-100_i32 : i32 to vector<1x128xi32>
    %16 = arith.cmpi ne, %1, %15 : vector<1x128xi32>
    %cst_6 = arith.constant 0.000000e+00 : f32
    %17 = vector.broadcast %cst_6 : f32 to vector<8x128xf32>
    %18 = arith.select %14, %0, %17 : vector<8x128xi1>, vector<8x128xf32>
    %cst_7 = arith.constant dense<0.000000e+00> : vector<128xf32>
    %19 = vector.multi_reduction <add>, %18, %cst_7 [0] : vector<8x128xf32> to vector<128xf32>
    %20 = vector.shape_cast %19 : vector<128xf32> to vector<1x128xf32>
    %cst_8 = arith.constant 0.000000e+00 : f32
    %21 = vector.shape_cast %2 : vector<8x1xf32> to vector<8x1xf32>
    %22 = vector.broadcast %21 : vector<8x1xf32> to vector<8x128xf32>
    %23 = vector.broadcast %cst_8 : f32 to vector<8x128xf32>
    %24 = arith.select %14, %22, %23 : vector<8x128xi1>, vector<8x128xf32>
    %cst_9 = arith.constant dense<0.000000e+00> : vector<128xf32>
    %25 = vector.multi_reduction <add>, %24, %cst_9 [0] : vector<8x128xf32> to vector<128xf32>
    %26 = vector.shape_cast %25 : vector<128xf32> to vector<1x128xf32>
    %27 = arith.subf %20, %11 : vector<1x128xf32>
    %cst_10 = arith.constant 0.000000e+00 : f32
    %28 = vector.broadcast %cst_10 : f32 to vector<1x128xf32>
    %29 = arith.subf %28, %26 : vector<1x128xf32>
    %30 = arith.mulf %29, %27 : vector<1x128xf32>
    %cst_11 = arith.constant 0.000000e+00 : f32
    %31 = vector.broadcast %cst_11 : f32 to vector<1x128xf32>
    %32 = arith.select %16, %30, %31 : vector<1x128xi1>, vector<1x128xf32>
    %cst_12 = arith.constant 0.000000e+00 : f32
    %33 = vector.broadcast %cst_12 : f32 to vector<1x128xf32>
    %34 = arith.subf %33, %32 : vector<1x128xf32>
    %35 = math.exp %34 : vector<1x128xf32>
    %cst_13 = arith.constant 1.000000e+00 : f32
    %36 = vector.broadcast %cst_13 : f32 to vector<1x128xf32>
    %37 = arith.subf %36, %35 : vector<1x128xf32>
    %cst_14 = arith.constant 0.000000e+00 : f32
    %38 = vector.broadcast %cst_14 : f32 to vector<1x128xf32>
    %39 = arith.maximumf %37, %38 : vector<1x128xf32>
    %40 = arith.mulf %39, %39 : vector<1x128xf32>
    %41 = arith.mulf %40, %32 : vector<1x128xf32>
    %cst_15 = arith.constant dense<0.000000e+00> : vector<1xf32>
    %42 = vector.multi_reduction <add>, %41, %cst_15 [1] : vector<1x128xf32> to vector<1xf32>
    %43 = vector.shape_cast %42 : vector<1xf32> to vector<1x1xf32>
    %44 = vector.shape_cast %43 : vector<1x1xf32> to vector<1x1xf32>
    %45 = vector.broadcast %44 : vector<1x1xf32> to vector<1x128xf32>
    %c0_16 = arith.constant 0 : index
    %c0_17 = arith.constant 0 : index
    %46 = vector.load %arg4[%c0_16, %c0_17] : memref<1x128xf32, #tpu.memory_space<vmem>>, vector<1x128xf32>
    tpu.vector_store %arg4[%c0_16, %c0_17], %45 {strides = array<i32>} : memref<1x128xf32, #tpu.memory_space<vmem>>, vector<1x128xf32>,
    return
  }
  func.func @transform_0(%arg0: i32) -> (i32, i32) {
    %c0_i32 = arith.constant 0 : i32
    %c0_i32_0 = arith.constant 0 : i32
    return %c0_i32, %arg0 : i32, i32
  }
  func.func @transform_1(%arg0: i32) -> (i32, i32) {
    %c0_i32 = arith.constant 0 : i32
    %c0_i32_0 = arith.constant 0 : i32
    return %c0_i32, %arg0 : i32, i32
  }
  func.func @transform_2(%arg0: i32) -> (i32, i32) {
    %c0_i32 = arith.constant 0 : i32
    %c0_i32_0 = arith.constant 0 : i32
    %c0_i32_1 = arith.constant 0 : i32
    return %c0_i32, %c0_i32_0 : i32, i32
  }
  func.func @transform_3(%arg0: i32) -> (i32, i32) {
    %c0_i32 = arith.constant 0 : i32
    %c0_i32_0 = arith.constant 0 : i32
    return %c0_i32, %arg0 : i32, i32
  }
}

</mosaic_0001>

<bundles_post_ra>
// kernel: tpu_custom_call.1
= control target key start
LH: loop header
LB: loop body
LE: loop exit
PB: predicated region body
PF: predicated region fallthrough
CT: control target
= control target key end

     0   :  { %s165_s0 = inlined_call_operand.vmem [shape: f32[8,128], index: 0, kind: input, shape index: {}]   ;;  %s166_s1 = inlined_call_operand.vmem [shape: s32[1,128], index: 1, kind: input, shape index: {}]   ;;  %s167_s2 = inlined_call_operand.vmem [shape: f32[8,1], index: 2, kind: input, shape index: {}]   ;;  %s168_s3 = inlined_call_operand.hbm [shape: f32[1,128], index: 3, kind: output, shape index: {}]  }
   0x1   :  { %v17_v0 = vld [vmem:[%s167_s2] sm:$0xff] }
   0x2   :  { %8 = vsyncpa [#allocation3], 0  ;;  %v128_v1 = vmov 0   ;;  %v15_v2 = vld [vmem:[%s165_s0] sm:$0xff]  ;;  %v36_v13 = vlaneseq  ;;  %vm71_vm2 = vcmask 1040384   ;;  %s129_s18 = smov [#allocation2]  }
   0x3   :  { %94 = vset.pattern.permute.xlu0 %v128_v1  ;;  %v18_v3 = vrot.slane %v15_v2, 4  ;;  %v95_v16 = vld [vmem:[%s166_s1] ss:$0 sm:$0xff]  ;;  %s81_s19 = sshll.u32 %s129_s18, 4  ;;  %s83_s21 = sshll.u32 %s168_s3, 4  ;;  %s82_s19 = int_to_ptr.vmem [resolvable:$true] %s81_s19  ;;  %s84_s21 = int_to_ptr.hbm [resolvable:$true] %s83_s21 }
   0x4   :  { %50 = vperm.xlu0 %94, %v17_v0   ;;  %v37_v15 = vshrl.u32 %v36_v13, 7  ;;  %v16_v38 = vld [vmem:[%s166_s1] sm:$0x1] }
   0x5   :  { %v19_v4 = vmax.f32 %v15_v2, %v18_v3  ;;  %vm40_vm1 = vcmp.ne.s32.totalorder %v16_v38, 4294967196 }
   0x6   :  { %vm39_vm0 = vcmp.eq.s32.totalorder %v37_v15, %v95_v16 }
   0x7   :  { %v20_v5 = vrot.slane %v19_v4, 2  ;;  %v41_v19 = vsel %vm39_vm0, %v15_v2, 0.0 }
   0x8   :  { %v42_v21 = vrot.slane %v41_v19, 4 }
   0x9   :  { %v21_v6 = vmax.f32 %v19_v4, %v20_v5 }
   0xa   :  { %v43_v23 = vadd.f32 %v42_v21, %v41_v19 }
   0xb   :  { %v22_v7 = vrot.slane %v21_v6, 1 }
   0xc   :  { %v44_v24 = vrot.slane %v43_v23, 2 }
   0xd   :  { %v23_v8 = vmax.f32 %v21_v6, %v22_v7 }
   0xe   :  { %v45_v26 = vadd.f32 %v44_v24, %v43_v23 }
   0xf   :  { %v24_v9 = vsub.f32 %v15_v2, %v23_v8 }
  0x10   :  { %v46_v30 = vrot.slane %v45_v26, 1 }
  0x11   :  { %v25_v10 = vmul.f32 1.442695, %v24_v9 }
  0x12   :  { %v47_v34 = vadd.f32 %v46_v30, %v45_v26 }
  0x13   :  { %96 = vpow2.f32 %v25_v10 }
  0x19   :  { %v97_v11 = vpop.eup %96 }
  0x1a   :  { %v27_v12 = vrot.slane %v97_v11, 4 }
  0x1c   :  { %v28_v14 = vadd.f32 %v97_v11, %v27_v12 }
  0x1e   :  { %v29_v17 = vrot.slane %v28_v14, 2 }
  0x20   :  { %v30_v18 = vadd.f32 %v29_v17, %v28_v14 }
  0x22   :  { %v31_v20 = vrot.slane %v30_v18, 1 }
  0x24   :  { %v32_v22 = vadd.f32 %v31_v20, %v30_v18 }
  0x26   :  { %98 = vlog2.f32 %v32_v22 }
  0x2c   :  { %v99_v27 = vpop.eup %98 }
  0x2d   :  { %v34_v32 = vmul.f32 0.6931472, %v99_v27 }
  0x2f   :  { %v35_v36 = vadd.f32 %v34_v32, %v23_v8 }
  0x31   :  { %v60_v40 = vsub.f32 %v47_v34, %v35_v36 }
  0x76   :  { %v51_v25 = vpop.permute.xlu0 %50 }
  0x77   :  { %v53_v28 = vsel %vm39_vm0, %v51_v25, 0.0 }
  0x78   :  { %v54_v29 = vrot.slane %v53_v28, 4 }
  0x7a   :  { %v55_v31 = vadd.f32 %v54_v29, %v53_v28 }
  0x7c   :  { %v56_v33 = vrot.slane %v55_v31, 2 }
  0x7e   :  { %v57_v35 = vadd.f32 %v56_v33, %v55_v31 }
  0x80   :  { %v58_v37 = vrot.slane %v57_v35, 1 }
  0x82   :  { %v59_v39 = vadd.f32 %v58_v37, %v57_v35 }
  0x84   :  { %v61_v41 = vsub.f32 0.0, %v59_v39 }
  0x86   :  { %v62_v42 = vmul.f32 %v61_v41, %v60_v40 }
  0x88   :  { %v63_v43 = vsel %vm40_vm1, %v62_v42, 0.0 }
  0x89   :  { %v64_v44 = vsub.f32 0.0, %v63_v43 }
  0x8b   :  { %v65_v45 = vmul.f32 1.442695, %v64_v44 }
  0x8d   :  { %100 = vpow2.f32 %v65_v45 }
  0x93   :  { %v101_v46 = vpop.eup %100 }
  0x94   :  { %v67_v47 = vsub.f32 1.0, %v101_v46 }
  0x96   :  { %v68_v48 = vmax.f32 %v67_v47, 0.0 }
  0x98   :  { %v69_v49 = vmul.f32 %v68_v48, %v68_v48 }
  0x9a   :  { %v70_v50 = vmul.f32 %v69_v49, %v63_v43 }
  0x9c   :  { %v72_v51 = vsel %vm71_vm2, %v70_v50, 0.0 }
  0x9d   :  { %73 = vadd.xlane.f32.xlu0 %v72_v51 }
 0x110   :  { %v74_v52 = vpop.xlane.xlu0 %73 }
 0x111   :  { %75 = vst [vmem:[#allocation2] sm:$0x1] %v74_v52 }
 0x112   :  { %86 = dma.vmem_to_hbm [thread:$0]  %s82_s19, 16, %s84_s21, [#allocation3]  }
 0x113   :  { %126 = dma.done.wait [#allocation3], 16  }
 0x114   :  { %127 = vsyncadd [#allocation3], 4294967280 }
 0x115   :  { %91 = vsyncpa [#allocation3], 1 }

</bundles_post_ra>
